<compile_context>
chip_gen: v7x
topology: tpu7x:2x2x1
jax: 0.10.0
libtpu: 0.0.40
codegen_flags: <defaults>
</compile_context>

<pallas_src>
import jax
import jax.numpy as jnp
from jax.experimental import pallas as pl
from jax.experimental.pallas import tpu as pltpu


def _silu(x):
    return x * jax.nn.sigmoid(x)


# --------------------------------------------------------------------------
# 1. node prep kernel (gridless, O(N*H)): mean removal, encoder, time channel,
#    and the shared-input edge projections h @ [ew1a | ew1b] (one wide matmul).
# --------------------------------------------------------------------------
def prep_kernel(pos_ref, posT_ref, feat_ref, mem_ref, memT_ref, invc_ref, invcr_ref,
                t_ref, enc_w1_ref, enc_b1_ref, enc_w2_ref, enc_b2_ref, ew1ab_ref,
                posc_ref, poscT_ref, h_ref, hiw_ref, hjw_ref):
    f32 = jnp.float32
    pos = pos_ref[...]                                               # [N, 3]
    mem = mem_ref[...]                                               # [N, G]
    memT = memT_ref[...]                                             # [G, N]

    # remove_mean_batch in both orientations (avoids in-kernel transposes)
    mean = jnp.dot(memT, pos, preferred_element_type=f32) * invc_ref[...]     # [G, 3]
    pos_c = pos - jnp.dot(mem, mean, preferred_element_type=f32)              # [N, 3]
    posc_ref[...] = pos_c
    meanT = jnp.dot(posT_ref[...], mem, preferred_element_type=f32) * invcr_ref[...]
    poscT_ref[...] = posT_ref[...] - jnp.dot(meanT, memT, preferred_element_type=f32)

    # node encoder MLP (swish, last layer linear)
    x = feat_ref[...]                                                # [N, F]
    h = _silu(jnp.dot(x, enc_w1_ref[...], preferred_element_type=f32) + enc_b1_ref[...])
    h = jnp.dot(h, enc_w2_ref[...], preferred_element_type=f32) + enc_b2_ref[...]
    Hc = h.shape[1]
    # condition_time: OVERWRITE the last channel with t (robust to real weights)
    lane = jax.lax.broadcasted_iota(jnp.int32, h.shape, 1)
    h = jnp.where(lane == (Hc - 1), t_ref[0, 0], h)
    h_ref[...] = h

    # shared-input concat matmul: [hi_w | hj_w] = h @ [ew1a | ew1b]
    hw = jnp.dot(h, ew1ab_ref[...], preferred_element_type=f32)      # [N, 2H]
    hiw_ref[...] = hw[:, :Hc]
    hjw_ref[...] = hw[:, Hc:]


# --------------------------------------------------------------------------
# 2. tiled edge kernel over an (i_block, j_block) grid.  Per-row accumulators
#    (message aggregate, rowsum(W), W @ x) live in the revisited output block
#    across the j ("arbitrary") axis; the i axis is "parallel" (v7x megacore).
#    Cross-graph tiles are skipped via scalar-prefetched per-block id ranges.
# --------------------------------------------------------------------------
def edge_kernel(bmin_ref, bmax_ref,
                hiw_ref, hjw_ref, xi_ref, xj_ref, xTj_ref, bi_ref, bj_ref,
                ew1c_ref, eb1_ref, ew2_ref, eb2_ref,
                cw1_ref, cb1_ref, cw2_ref, cb2_ref,
                agg_ref, rsw_ref, wx_ref):
    i = pl.program_id(0)
    j = pl.program_id(1)
    f32 = jnp.float32
    bf16 = jnp.bfloat16

    @pl.when(j == 0)
    def _init():
        agg_ref[...] = jnp.zeros_like(agg_ref)
        rsw_ref[...] = jnp.zeros_like(rsw_ref)
        wx_ref[...] = jnp.zeros_like(wx_ref)

    # block-diagonal adjacency: batch ids are sorted, so non-overlapping id
    # ranges guarantee an all-zero tile -> skip it entirely.
    overlap = jnp.logical_and(bmin_ref[j] <= bmax_ref[i],
                              bmin_ref[i] <= bmax_ref[j])

    @pl.when(overlap)
    def _compute():
        TI, Hc = agg_ref.shape
        TJ = bj_ref.shape[1]
        hiw = hiw_ref[...]                                           # [TI, H]
        hjw = hjw_ref[...]                                           # [TJ, H]
        xi = xi_ref[...]                                             # [TI, 3]
        xTj = xTj_ref[...]                                           # [3, TJ]

        # exact pairwise squared distances on the VPU (lane-dense [TI, TJ])
        d2 = jnp.zeros((TI, TJ), f32)
        for k in range(3):
            diff = xi[:, k:k + 1] - xTj[k:k + 1, :]
            d2 = d2 + diff * diff

        # adjacency built in-kernel: same graph & not a self edge
        same = bi_ref[...] == bj_ref[...]                            # [TI, TJ]
        rg = i * TI + jax.lax.broadcasted_iota(jnp.int32, (TI, 1), 0)
        cg = j * TJ + jax.lax.broadcasted_iota(jnp.int32, (1, TJ), 1)
        adj = jnp.where(jnp.logical_and(same, rg != cg), 1.0, 0.0).astype(f32)

        # EGNN-style edge messages for this tile only
        pre = (hiw[:, None, :] + hjw[None, :, :]
               + d2[:, :, None] * ew1c_ref[...] + eb1_ref[...])      # [TI, TJ, H]
        mb = _silu(pre).reshape(TI * TJ, Hc).astype(bf16)
        z2 = jnp.dot(mb, ew2_ref[...], preferred_element_type=f32) + eb2_ref[...]
        m2 = _silu(z2).reshape(TI, TJ, Hc) * adj[:, :, None]         # masked messages

        # incremental node aggregation across j blocks
        agg_ref[...] += jnp.sum(m2, axis=1)

        # coordinate branch -> per-edge scalar weight (bf16 MXU, f32 accumulate)
        m2b = m2.reshape(TI * TJ, Hc).astype(bf16)
        wgt = _silu(jnp.dot(m2b, cw1_ref[...], preferred_element_type=f32) + cb1_ref[...])
        wgt = jnp.dot(wgt, cw2_ref[...], preferred_element_type=f32) + cb2_ref[...]
        W = wgt.reshape(TI, TJ) * adj                                # [TI, TJ]
        rsw_ref[...] += jnp.sum(W, axis=1, keepdims=True)            # rowsum(W)
        wx_ref[...] += jnp.dot(W, xj_ref[...], preferred_element_type=f32)


# --------------------------------------------------------------------------
# 3. final node kernel (gridless, O(N*H)): node update, gated readout
#    (same-input weights concatenated / block-diagonalised), scatter_sum, forces.
# --------------------------------------------------------------------------
def final_kernel(h_ref, agg_ref, posc_ref, rsw_ref, wx_ref, valid_ref, memT_ref,
                 nw1a_ref, nw1b_ref, nb1_ref, nw2_ref, nb2_ref,
                 rgw1_ref, rgb1_ref, w2b_ref, b2b_ref, w3b_ref, b3b_ref,
                 ae_ref, forces_ref):
    f32 = jnp.float32
    h = h_ref[...]
    agg = agg_ref[...]
    nh = _silu(jnp.dot(h, nw1a_ref[...], preferred_element_type=f32)
               + jnp.dot(agg, nw1b_ref[...], preferred_element_type=f32)
               + nb1_ref[...])
    h_out = h + jnp.dot(nh, nw2_ref[...], preferred_element_type=f32) + nb2_ref[...]

    # GatedMLP readout: y-branch and gate-branch fused into single wide matmuls
    yg = _silu(jnp.dot(h_out, rgw1_ref[...], preferred_element_type=f32) + rgb1_ref[...])
    yg = _silu(jnp.dot(yg, w2b_ref[...], preferred_element_type=f32) + b2b_ref[...])
    out3 = jnp.dot(yg, w3b_ref[...], preferred_element_type=f32) + b3b_ref[...]   # [N, 2]
    node_out = out3[:, 0:1] * jax.nn.sigmoid(out3[:, 1:2]) * valid_ref[...]

    ae_ref[...] = jnp.dot(memT_ref[...], node_out, preferred_element_type=f32)    # scatter_sum
    forces_ref[...] = (posc_ref[...] * rsw_ref[...] - wx_ref[...]) * valid_ref[...]


# --------------------------------------------------------------------------
# parameters (deterministic synthetic; shapes follow the module __init__)
# --------------------------------------------------------------------------
def init_params(key, feat_dim, hidden=32):
    f32, bf16 = jnp.float32, jnp.bfloat16
    enc_hidden = 2 * feat_dim
    embed_dim = hidden - 1                     # condition_time appends 1 channel
    keys = iter(jax.random.split(key, 24))

    def W(i, o):
        return jax.random.normal(next(keys), (i, o), f32) / jnp.sqrt(jnp.float32(i))

    def B(o):
        return jnp.zeros((1, o), f32)

    enc_w1 = W(feat_dim, enc_hidden); enc_b1 = B(enc_hidden)
    enc_w2 = jnp.pad(W(enc_hidden, embed_dim), ((0, 0), (0, hidden - embed_dim)))
    enc_b2 = B(hidden)

    ew1a = W(hidden, hidden); ew1b = W(hidden, hidden)
    ew1c = W(1, hidden); eb1 = B(hidden)
    ew2 = W(hidden, hidden); eb2 = B(hidden)
    cw1 = W(hidden, hidden); cb1 = B(hidden)
    cw2 = W(hidden, 1); cb2 = B(1)
    nw1a = W(hidden, hidden); nw1b = W(hidden, hidden); nb1 = B(hidden)
    nw2 = W(hidden, hidden); nb2 = B(hidden)

    rw1 = W(hidden, hidden); rb1 = B(hidden)
    rw2 = W(hidden, hidden); rb2 = B(hidden)
    rw3 = W(hidden, 1); rb3 = B(1)
    gw1 = W(hidden, hidden); gb1 = B(hidden)
    gw2 = W(hidden, hidden); gb2 = B(hidden)
    gw3 = W(hidden, 1); gb3 = B(1)

    z = jnp.zeros((hidden, hidden), f32)
    z1 = jnp.zeros((hidden, 1), f32)
    return dict(
        hidden=hidden,
        enc_w1=enc_w1, enc_b1=enc_b1, enc_w2=enc_w2, enc_b2=enc_b2,
        ew1ab=jnp.concatenate([ew1a, ew1b], axis=1),                 # [H, 2H]
        ew1c=ew1c, eb1=eb1,
        ew2=ew2.astype(bf16), eb2=eb2,                               # bf16 MXU operands
        cw1=cw1.astype(bf16), cb1=cb1, cw2=cw2, cb2=cb2,
        nw1a=nw1a, nw1b=nw1b, nb1=nb1, nw2=nw2, nb2=nb2,
        rgw1=jnp.concatenate([rw1, gw1], axis=1),                    # [H, 2H]
        rgb1=jnp.concatenate([rb1, gb1], axis=1),
        w2blk=jnp.concatenate([jnp.concatenate([rw2, z], axis=1),
                               jnp.concatenate([z, gw2], axis=1)], axis=0),  # [2H, 2H]
        b2blk=jnp.concatenate([rb2, gb2], axis=1),
        w3blk=jnp.concatenate([jnp.concatenate([rw3, z1], axis=1),
                               jnp.concatenate([z1, gw3], axis=1)], axis=0),  # [2H, 2]
        b3blk=jnp.concatenate([rb3, gb3], axis=1),
    )


# --------------------------------------------------------------------------
# wrapper: pad to a tile multiple, build membership / per-block id ranges,
# run prep -> tiled edge sweep -> final readout.  `batch` must be sorted.
# --------------------------------------------------------------------------
def potential_forward(pos, feat, batch, num_graphs, t_scalar, params, tile=128):
    f32 = jnp.float32
    N = pos.shape[0]
    G = int(num_graphs)
    H = params["hidden"]
    Npad = ((N + tile - 1) // tile) * tile
    NB = Npad // tile
    pad = Npad - N

    pos_p = jnp.pad(pos.astype(f32), ((0, pad), (0, 0)))
    feat_p = jnp.pad(feat.astype(f32), ((0, pad), (0, 0)))
    batch_p = (jnp.concatenate([batch.astype(jnp.int32), jnp.full((pad,), G, jnp.int32)])
               if pad else batch.astype(jnp.int32))

    mem = (batch_p[:, None] == jnp.arange(G)[None, :]).astype(f32)   # [Npad, G]
    memT = jnp.transpose(mem)                                        # [G, Npad]
    counts = jnp.maximum(jnp.sum(mem, axis=0), 1.0)
    invc = (1.0 / counts)[:, None]
    invcr = (1.0 / counts)[None, :]
    valid = (batch_p < G).astype(f32)[:, None]                       # [Npad, 1]
    bidf = batch_p.astype(f32)[:, None]                              # [Npad, 1]
    bidfT = batch_p.astype(f32)[None, :]                             # [1, Npad]
    bblk = batch_p.reshape(NB, tile)
    bmin = bblk[:, 0].astype(jnp.int32)
    bmax = bblk[:, -1].astype(jnp.int32)
    posT = jnp.transpose(pos_p)                                      # [3, Npad]
    t_arr = jnp.full((1, 1), t_scalar, f32)

    p = params
    vmem = pl.BlockSpec(memory_space=pltpu.MemorySpace.VMEM)

    # ---- 1. node prep ----
    prep_in = [pos_p, posT, feat_p, mem, memT, invc, invcr, t_arr,
               p["enc_w1"], p["enc_b1"], p["enc_w2"], p["enc_b2"], p["ew1ab"]]
    prep_out_shape = (jax.ShapeDtypeStruct((Npad, 3), f32),
                      jax.ShapeDtypeStruct((3, Npad), f32),
                      jax.ShapeDtypeStruct((Npad, H), f32),
                      jax.ShapeDtypeStruct((Npad, H), f32),
                      jax.ShapeDtypeStruct((Npad, H), f32))
    pos_c, pos_cT, h, hiw, hjw = pl.pallas_call(
        prep_kernel, out_shape=prep_out_shape,
        in_specs=[vmem] * len(prep_in), out_specs=(vmem,) * 5,
    )(*prep_in)

    # ---- 2. tiled edge / message passing ----
    T = tile

    def imap_i(i, j, *_):  # i-block rows
        return (i, 0)

    def imap_j(i, j, *_):  # j-block rows
        return (j, 0)

    def imap_0j(i, j, *_):  # j-block along lanes
        return (0, j)

    def imap_w(i, j, *_):   # whole (small) weight
        return (0, 0)

    edge_in_specs = [
        pl.BlockSpec((T, H), imap_i),        # hi_w
        pl.BlockSpec((T, H), imap_j),        # hj_w
        pl.BlockSpec((T, 3), imap_i),        # pos_c (i rows)
        pl.BlockSpec((T, 3), imap_j),        # pos_c (j rows)
        pl.BlockSpec((3, T), imap_0j),       # pos_c^T (j cols)
        pl.BlockSpec((T, 1), imap_i),        # batch id (i)
        pl.BlockSpec((1, T), imap_0j),       # batch id (j)
        pl.BlockSpec((1, H), imap_w),        # ew1c
        pl.BlockSpec((1, H), imap_w),        # eb1
        pl.BlockSpec((H, H), imap_w),        # ew2 (bf16)
        pl.BlockSpec((1, H), imap_w),        # eb2
        pl.BlockSpec((H, H), imap_w),        # cw1 (bf16)
        pl.BlockSpec((1, H), imap_w),        # cb1
        pl.BlockSpec((H, 1), imap_w),        # cw2
        pl.BlockSpec((1, 1), imap_w),        # cb2
    ]
    edge_out_specs = (pl.BlockSpec((T, H), imap_i),
                      pl.BlockSpec((T, 1), imap_i),
                      pl.BlockSpec((T, 3), imap_i))
    edge_out_shape = (jax.ShapeDtypeStruct((Npad, H), f32),
                      jax.ShapeDtypeStruct((Npad, 1), f32),
                      jax.ShapeDtypeStruct((Npad, 3), f32))
    grid_spec = pltpu.PrefetchScalarGridSpec(
        num_scalar_prefetch=2,
        grid=(NB, NB),
        in_specs=edge_in_specs,
        out_specs=edge_out_specs)
    agg, rsw, wx = pl.pallas_call(
        edge_kernel,
        out_shape=edge_out_shape,
        grid_spec=grid_spec,
        compiler_params=pltpu.CompilerParams(
            dimension_semantics=("parallel", "arbitrary"),
            vmem_limit_bytes=48 * 1024 * 1024),
    )(bmin, bmax,
      hiw, hjw, pos_c, pos_c, pos_cT, bidf, bidfT,
      p["ew1c"], p["eb1"], p["ew2"], p["eb2"],
      p["cw1"], p["cb1"], p["cw2"], p["cb2"])

    # ---- 3. node update + readout + scatter_sum + forces ----
    fin_in = [h, agg, pos_c, rsw, wx, valid, memT,
              p["nw1a"], p["nw1b"], p["nb1"], p["nw2"], p["nb2"],
              p["rgw1"], p["rgb1"], p["w2blk"], p["b2blk"], p["w3blk"], p["b3blk"]]
    fin_out_shape = (jax.ShapeDtypeStruct((G, 1), f32),
                     jax.ShapeDtypeStruct((Npad, 3), f32))
    ae, forces = pl.pallas_call(
        final_kernel, out_shape=fin_out_shape,
        in_specs=[vmem] * len(fin_in), out_specs=(vmem, vmem),
    )(*fin_in)
    return ae[:, 0], forces[:N]


if __name__ == "__main__":
    key = jax.random.PRNGKey(0)
    k_pos, k_oh, k_chg, k_par = jax.random.split(key, 4)

    G = 2                 # graphs in the batch
    nodes_per = 8
    N = G * nodes_per     # total nodes
    n_types = 5           # one-hot size -> node_nfs = [3 + 5 + 1] = [9]

    pos = jax.random.normal(k_pos, (N, 3), jnp.float32)
    types = jax.random.randint(k_oh, (N,), 0, n_types)
    one_hot = jax.nn.one_hot(types, n_types, dtype=jnp.float32)
    charges = jax.random.randint(k_chg, (N,), 1, 9).astype(jnp.float32)
    feat = jnp.concatenate([one_hot, charges[:, None]], axis=1)      # xh[:, pos_dim:]
    batch = jnp.repeat(jnp.arange(G), nodes_per)                     # combined_mask (sorted)

    params = init_params(k_par, feat_dim=feat.shape[1], hidden=32)

    # Potential.forward always calls _forward with t = tensor([0.0])
    ae, forces = potential_forward(pos, feat, batch, G, 0.0, params)
    jax.block_until_ready((ae, forces))
    assert ae.shape == (G,) and forces.shape == (N, 3)
    print("KERNEL_OK")
</pallas_src>

<mosaic_0001>
module attributes {stable_mosaic.version = 11 : i64} {
  func.func @prep_kernel(%arg0: memref<128x3xf32, #tpu.memory_space<vmem>>, %arg1: memref<3x128xf32, #tpu.memory_space<vmem>>, %arg2: memref<128x6xf32, #tpu.memory_space<vmem>>, %arg3: memref<128x2xf32, #tpu.memory_space<vmem>>, %arg4: memref<2x128xf32, #tpu.memory_space<vmem>>, %arg5: memref<2x1xf32, #tpu.memory_space<vmem>>, %arg6: memref<1x2xf32, #tpu.memory_space<vmem>>, %arg7: memref<1x1xf32, #tpu.memory_space<vmem>>, %arg8: memref<6x12xf32, #tpu.memory_space<vmem>>, %arg9: memref<1x12xf32, #tpu.memory_space<vmem>>, %arg10: memref<12x32xf32, #tpu.memory_space<vmem>>, %arg11: memref<1x32xf32, #tpu.memory_space<vmem>>, %arg12: memref<32x64xf32, #tpu.memory_space<vmem>>, %arg13: memref<128x3xf32, #tpu.memory_space<vmem>>, %arg14: memref<3x128xf32, #tpu.memory_space<vmem>>, %arg15: memref<128x32xf32, #tpu.memory_space<vmem>>, %arg16: memref<128x32xf32, #tpu.memory_space<vmem>>, %arg17: memref<128x32xf32, #tpu.memory_space<vmem>>) attributes {dimension_semantics = [], scalar_prefetch = 0 : i64, scratch_operands = 0 : i64, tpu.core_type = #tpu.core_type<tc>} {
    %c0 = arith.constant 0 : index
    %c0_0 = arith.constant 0 : index
    %0 = vector.load %arg0[%c0, %c0_0] : memref<128x3xf32, #tpu.memory_space<vmem>>, vector<128x3xf32>
    %c0_1 = arith.constant 0 : index
    %c0_2 = arith.constant 0 : index
    %1 = vector.load %arg3[%c0_1, %c0_2] : memref<128x2xf32, #tpu.memory_space<vmem>>, vector<128x2xf32>
    %c0_3 = arith.constant 0 : index
    %c0_4 = arith.constant 0 : index
    %2 = vector.load %arg4[%c0_3, %c0_4] : memref<2x128xf32, #tpu.memory_space<vmem>>, vector<2x128xf32>
    %cst = arith.constant dense<0.000000e+00> : vector<2x3xf32>
    %3 = tpu.matmul %2, %0, %cst {dimension_numbers = #tpu.dot_dimension_numbers<[1], [0], [0], [1], [0, 0, 1, 1], [], []>} : vector<2x128xf32>, vector<128x3xf32>, vector<2x3xf32> -> vector<2x3xf32>
    %c0_5 = arith.constant 0 : index
    %c0_6 = arith.constant 0 : index
    %4 = vector.load %arg5[%c0_5, %c0_6] : memref<2x1xf32, #tpu.memory_space<vmem>>, vector<2x1xf32>
    %5 = vector.broadcast %4 : vector<2x1xf32> to vector<2x3xf32>
    %6 = arith.mulf %3, %5 : vector<2x3xf32>
    %cst_7 = arith.constant dense<0.000000e+00> : vector<128x3xf32>
    %7 = tpu.matmul %1, %6, %cst_7 {dimension_numbers = #tpu.dot_dimension_numbers<[1], [0], [0], [1], [0, 0, 1, 1], [], []>} : vector<128x2xf32>, vector<2x3xf32>, vector<128x3xf32> -> vector<128x3xf32>
    %8 = arith.subf %0, %7 : vector<128x3xf32>
    %c0_8 = arith.constant 0 : index
    %c0_9 = arith.constant 0 : index
    %9 = vector.load %arg13[%c0_8, %c0_9] : memref<128x3xf32, #tpu.memory_space<vmem>>, vector<128x3xf32>
    tpu.vector_store %arg13[%c0_8, %c0_9], %8 {strides = array<i32>} : memref<128x3xf32, #tpu.memory_space<vmem>>, vector<128x3xf32>,
    %c0_10 = arith.constant 0 : index
    %c0_11 = arith.constant 0 : index
    %10 = vector.load %arg1[%c0_10, %c0_11] : memref<3x128xf32, #tpu.memory_space<vmem>>, vector<3x128xf32>
    %cst_12 = arith.constant dense<0.000000e+00> : vector<3x2xf32>
    %11 = tpu.matmul %10, %1, %cst_12 {dimension_numbers = #tpu.dot_dimension_numbers<[1], [0], [0], [1], [0, 0, 1, 1], [], []>} : vector<3x128xf32>, vector<128x2xf32>, vector<3x2xf32> -> vector<3x2xf32>
    %c0_13 = arith.constant 0 : index
    %c0_14 = arith.constant 0 : index
    %12 = vector.load %arg6[%c0_13, %c0_14] : memref<1x2xf32, #tpu.memory_space<vmem>>, vector<1x2xf32>
    %13 = vector.broadcast %12 : vector<1x2xf32> to vector<3x2xf32>
    %14 = arith.mulf %11, %13 : vector<3x2xf32>
    %c0_15 = arith.constant 0 : index
    %c0_16 = arith.constant 0 : index
    %15 = vector.load %arg1[%c0_15, %c0_16] : memref<3x128xf32, #tpu.memory_space<vmem>>, vector<3x128xf32>
    %cst_17 = arith.constant dense<0.000000e+00> : vector<3x128xf32>
    %16 = tpu.matmul %14, %2, %cst_17 {dimension_numbers = #tpu.dot_dimension_numbers<[1], [0], [0], [1], [0, 0, 1, 1], [], []>} : vector<3x2xf32>, vector<2x128xf32>, vector<3x128xf32> -> vector<3x128xf32>
    %17 = arith.subf %15, %16 : vector<3x128xf32>
    %c0_18 = arith.constant 0 : index
    %c0_19 = arith.constant 0 : index
    %18 = vector.load %arg14[%c0_18, %c0_19] : memref<3x128xf32, #tpu.memory_space<vmem>>, vector<3x128xf32>
    tpu.vector_store %arg14[%c0_18, %c0_19], %17 {strides = array<i32>} : memref<3x128xf32, #tpu.memory_space<vmem>>, vector<3x128xf32>,
    %c0_20 = arith.constant 0 : index
    %c0_21 = arith.constant 0 : index
    %19 = vector.load %arg2[%c0_20, %c0_21] : memref<128x6xf32, #tpu.memory_space<vmem>>, vector<128x6xf32>
    %c0_22 = arith.constant 0 : index
    %c0_23 = arith.constant 0 : index
    %20 = vector.load %arg8[%c0_22, %c0_23] : memref<6x12xf32, #tpu.memory_space<vmem>>, vector<6x12xf32>
    %cst_24 = arith.constant dense<0.000000e+00> : vector<128x12xf32>
    %21 = tpu.matmul %19, %20, %cst_24 {dimension_numbers = #tpu.dot_dimension_numbers<[1], [0], [0], [1], [0, 0, 1, 1], [], []>} : vector<128x6xf32>, vector<6x12xf32>, vector<128x12xf32> -> vector<128x12xf32>
    %c0_25 = arith.constant 0 : index
    %c0_26 = arith.constant 0 : index
    %22 = vector.load %arg9[%c0_25, %c0_26] : memref<1x12xf32, #tpu.memory_space<vmem>>, vector<1x12xf32>
    %23 = vector.broadcast %22 : vector<1x12xf32> to vector<128x12xf32>
    %24 = arith.addf %21, %23 : vector<128x12xf32>
    %25 = arith.negf %24 : vector<128x12xf32>
    %26 = math.exp %25 : vector<128x12xf32>
    %cst_27 = arith.constant 1.000000e+00 : f32
    %27 = vector.broadcast %cst_27 : f32 to vector<128x12xf32>
    %28 = arith.addf %27, %26 : vector<128x12xf32>
    %29 = arith.divf %27, %28 : vector<128x12xf32>
    %30 = arith.mulf %24, %29 : vector<128x12xf32>
    %c0_28 = arith.constant 0 : index
    %c0_29 = arith.constant 0 : index
    %31 = vector.load %arg10[%c0_28, %c0_29] : memref<12x32xf32, #tpu.memory_space<vmem>>, vector<12x32xf32>
    %cst_30 = arith.constant dense<0.000000e+00> : vector<128x32xf32>
    %32 = tpu.matmul %30, %31, %cst_30 {dimension_numbers = #tpu.dot_dimension_numbers<[1], [0], [0], [1], [0, 0, 1, 1], [], []>} : vector<128x12xf32>, vector<12x32xf32>, vector<128x32xf32> -> vector<128x32xf32>
    %c0_31 = arith.constant 0 : index
    %c0_32 = arith.constant 0 : index
    %33 = vector.load %arg11[%c0_31, %c0_32] : memref<1x32xf32, #tpu.memory_space<vmem>>, vector<1x32xf32>
    %34 = vector.broadcast %33 : vector<1x32xf32> to vector<128x32xf32>
    %35 = arith.addf %32, %34 : vector<128x32xf32>
    %36 = tpu.iota {dimensions = array<i32: 1>} : vector<128x32xi32>
    %c31_i32 = arith.constant 31 : i32
    %37 = vector.broadcast %c31_i32 : i32 to vector<128x32xi32>
    %38 = arith.cmpi eq, %36, %37 : vector<128x32xi32>
    %c0_33 = arith.constant 0 : index
    %c0_34 = arith.constant 0 : index
    %39 = vector.load %arg7[%c0_33, %c0_34] : memref<1x1xf32, #tpu.memory_space<vmem>>, vector<1x1xf32>
    %40 = vector.extract %39[0, 0] : f32 from vector<1x1xf32>
    %41 = vector.broadcast %40 : f32 to vector<128x32xf32>
    %42 = arith.select %38, %41, %35 : vector<128x32xi1>, vector<128x32xf32>
    %c0_35 = arith.constant 0 : index
    %c0_36 = arith.constant 0 : index
    %43 = vector.load %arg15[%c0_35, %c0_36] : memref<128x32xf32, #tpu.memory_space<vmem>>, vector<128x32xf32>
    tpu.vector_store %arg15[%c0_35, %c0_36], %42 {strides = array<i32>} : memref<128x32xf32, #tpu.memory_space<vmem>>, vector<128x32xf32>,
    %c0_37 = arith.constant 0 : index
    %c0_38 = arith.constant 0 : index
    %44 = vector.load %arg12[%c0_37, %c0_38] : memref<32x64xf32, #tpu.memory_space<vmem>>, vector<32x64xf32>
    %cst_39 = arith.constant dense<0.000000e+00> : vector<128x64xf32>
    %45 = tpu.matmul %42, %44, %cst_39 {dimension_numbers = #tpu.dot_dimension_numbers<[1], [0], [0], [1], [0, 0, 1, 1], [], []>} : vector<128x32xf32>, vector<32x64xf32>, vector<128x64xf32> -> vector<128x64xf32>
    %46 = vector.extract_strided_slice %45 {offsets = [0, 0], sizes = [128, 32], strides = [1, 1]} : vector<128x64xf32> to vector<128x32xf32>
    %c0_40 = arith.constant 0 : index
    %c0_41 = arith.constant 0 : index
    %47 = vector.load %arg16[%c0_40, %c0_41] : memref<128x32xf32, #tpu.memory_space<vmem>>, vector<128x32xf32>
    tpu.vector_store %arg16[%c0_40, %c0_41], %46 {strides = array<i32>} : memref<128x32xf32, #tpu.memory_space<vmem>>, vector<128x32xf32>,
    %48 = vector.extract_strided_slice %45 {offsets = [0, 32], sizes = [128, 32], strides = [1, 1]} : vector<128x64xf32> to vector<128x32xf32>
    %c0_42 = arith.constant 0 : index
    %c0_43 = arith.constant 0 : index
    %49 = vector.load %arg17[%c0_42, %c0_43] : memref<128x32xf32, #tpu.memory_space<vmem>>, vector<128x32xf32>
    tpu.vector_store %arg17[%c0_42, %c0_43], %48 {strides = array<i32>} : memref<128x32xf32, #tpu.memory_space<vmem>>, vector<128x32xf32>,
    return
  }
}

</mosaic_0001>

<bundles_post_ra>
// kernel: tpu_custom_call.1
= control target key start
LH: loop header
LB: loop body
LE: loop exit
PB: predicated region body
PF: predicated region fallthrough
CT: control target
= control target key end

     0   :  { %s2896_s0 = inlined_call_operand.vmem [shape: f32[128,3], index: 0, kind: input, shape index: {}]   ;;  %s2897_s1 = inlined_call_operand.vmem [shape: f32[3,128], index: 1, kind: input, shape index: {}]   ;;  %s2898_s2 = inlined_call_operand.vmem [shape: f32[128,6], index: 2, kind: input, shape index: {}]   ;;  %s2899_s3 = inlined_call_operand.vmem [shape: f32[128,2], index: 3, kind: input, shape index: {}]   ;;  %s2900_s4 = inlined_call_operand.vmem [shape: f32[2,128], index: 4, kind: input, shape index: {}]   ;;  %s2901_s5 = inlined_call_operand.vmem [shape: f32[2,1], index: 5, kind: input, shape index: {}]   ;;  %s2902_s6 = inlined_call_operand.vmem [shape: f32[1,2], index: 6, kind: input, shape index: {}]   ;;  %s2903_s7 = inlined_call_operand.<no memory space> [shape: f32[1,1], index: 7, kind: input, shape index: {}]   ;;  %s2904_s8 = inlined_call_operand.vmem [shape: f32[6,12], index: 8, kind: input, shape index: {}]   ;;  %s2905_s9 = inlined_call_operand.vmem [shape: f32[1,12], index: 9, kind: input, shape index: {}]   ;;  %s2906_s10 = inlined_call_operand.vmem [shape: f32[12,32], index: 10, kind: input, shape index: {}]   ;;  %s2907_s11 = inlined_call_operand.vmem [shape: f32[1,32], index: 11, kind: input, shape index: {}]   ;;  %s2908_s12 = inlined_call_operand.vmem [shape: f32[32,64], index: 12, kind: input, shape index: {}]   ;;  %s2909_s13 = inlined_call_operand.vmem [shape: f32[128,3], index: 13, kind: output, shape index: {0}]   ;;  %s2910_s14 = inlined_call_operand.hbm [shape: f32[3,128], index: 14, kind: output, shape index: {1}]   ;;  %s2911_s15 = inlined_call_operand.vmem [shape: f32[128,32], index: 15, kind: output, shape index: {2}]   ;;  %s2912_s16 = inlined_call_operand.vmem [shape: f32[128,32], index: 16, kind: output, shape index: {3}]   ;;  %s2913_s17 = inlined_call_operand.vmem [shape: f32[128,32], index: 17, kind: output, shape index: {4}]  }
   0x1   :  { %2915 = sst [smem:[#allocation6_spill]] %s2896_s0  ;;  %v23_v0 = vstv %s2903_s7 }
   0x2   :  { %2916 = sst [smem:[#allocation7_spill]] %s2897_s1  ;;  %24 = vst [vmem:[#allocation2] sm:$0x1] %v23_v0 }
   0x3   :  { %s2917_s28 = sld [smem:[#allocation6_spill]]  ;;  %v1998_v4 = vmov 0.0|0.0   ;;  %vm1999_vm0 = vmmov 0   ;;  %v2000_v7 = vmov 0.0   ;;  %v2001_v8 = vmov 0  }
   0x4   :  { %1836 = vmatprep.subr.bf16.mxu0 %v1998_v4  ;;  %1681 = vmatprep.mubr.msk.f32.mxu0 %vm1999_vm0, %v2000_v7  ;;  %v155_v12 = vld [vmem:[%s2901_s5] sm:$0x3] }
   0x5   :  { %1909 = vset.pattern.permute.xlu0 %v2001_v8 }
   0x6   :  { %158 = vperm.xlu0 %1909, %v155_v12  }
   0x9   :  { %v2101_v1 = vld [vmem:[%s2917_s28] sm:$0xff]  ;;  %v2106_v2 = vld [vmem:[%s2917_s28 + $0x8] sm:$0xff]  ;;  %v2111_v3 = vld [vmem:[%s2917_s28 + $0x10] sm:$0xff] }
   0xa   :  { %v1837_v5 = vpack.c.bf16 %v2106_v2, %v2101_v1  ;;  %v2119_v6 = vld [vmem:[%s2917_s28 + $0x18] sm:$0xff]  ;;  %v2129_v10 = vld [vmem:[%s2917_s28 + $0x20] sm:$0xff]  ;;  %v2134_v11 = vld [vmem:[%s2917_s28 + $0x28] sm:$0xff] }
   0xb   :  { %v1840_v9 = vpack.c.bf16 %v2119_v6, %v2111_v3 }
   0xc   :  { %1838 = vmatpush3.bf16.msra.mxu0 %v1837_v5 }
   0xd   :  { %1839 = vmatprep.subr.bf16.mxu0 %v1998_v4 }
   0xe   :  { %25 = vsyncpa [#allocation4], 0  ;;  %v1843_v13 = vpack.c.bf16 %v2134_v11, %v2129_v10  ;;  %v2145_v14 = vld [vmem:[%s2917_s28 + $0x30] sm:$0xff]  ;;  %v2150_v15 = vld [vmem:[%s2917_s28 + $0x38] sm:$0xff]  ;;  %vm211_vm1 = vcmask 1041408   ;;  %vm162_vm2 = vcmask 15360  }
   0xf   :  { %v1846_v16 = vpack.c.bf16 %v2150_v15, %v2145_v14  ;;  %v2158_v17 = vld [vmem:[%s2917_s28 + $0x40] sm:$0xff]  ;;  %v2163_v18 = vld [vmem:[%s2917_s28 + $0x48] sm:$0xff]  ;;  %v2171_v20 = vld [vmem:[%s2917_s28 + $0x50] sm:$0xff]  ;;  %s2918_s5 = sld [smem:[#allocation7_spill]]  ;;  %vm623_vm3 = vcmask 1045504   ;;  %vm574_vm4 = vcmask 48128  }
  0x10   :  { %1841 = vmatpush3.bf16.msra.mxu0 %v1840_v9  ;;  %v1849_v19 = vpack.c.bf16 %v2163_v18, %v2158_v17  ;;  %v2176_v21 = vld [vmem:[%s2917_s28 + $0x58] sm:$0xff]  ;;  %v2184_v23 = vld [vmem:[%s2917_s28 + $0x60] sm:$0xff]  ;;  %v2189_v24 = vld [vmem:[%s2917_s28 + $0x68] sm:$0xff]  ;;  %vm376_vm5 = vcmask 23552   ;;  %vm942_vm6 = vcmask 1043456   ;;  %vm2002_vm7 = vmmov 1  }
  0x11   :  { %1842 = vmatprep.subr.bf16.mxu0 %v1998_v4  ;;  %v1852_v22 = vpack.c.bf16 %v2176_v21, %v2171_v20  ;;  %v1855_v25 = vpack.c.bf16 %v2189_v24, %v2184_v23  ;;  %v2197_v26 = vld [vmem:[%s2917_s28 + $0x70] sm:$0xff]  ;;  %v2202_v27 = vld [vmem:[%s2917_s28 + $0x78] sm:$0xff]  ;;  %v84_v29 = vld [vmem:[%s2900_s4] sm:$0x3]  ;;  %vm893_vm9 = vcmask 97280   ;;  %vm1113_vm11 = vcmask 261120  }
  0x12   :  { %v1858_v28 = vpack.c.bf16 %v2202_v27, %v2197_v26  ;;  %v68_v30 = vld [vmem:[%s2899_s3] sm:$0xff]  ;;  %v69_v32 = vld [vmem:[%s2899_s3 + $0x8] sm:$0xff]  ;;  %v70_v37 = vld [vmem:[%s2899_s3 + $0x10] sm:$0xff]  ;;  %s2003_s30 = smov 96   ;;  %s2004_s25 = smov [#allocation3]  }
  0x13   :  { %1686 = vmatprep.mubr.msk.f32.mxu1 %vm162_vm2, %v68_v30  ;;  %v1861_v36 = vpack.c.bf16 %v69_v32, %v68_v30  ;;  %v71_v38 = vld [vmem:[%s2899_s3 + $0x18] sm:$0xff]  ;;  %v72_v40 = vld [vmem:[%s2899_s3 + $0x20] sm:$0xff]  ;;  %v73_v41 = vld [vmem:[%s2899_s3 + $0x28] sm:$0xff]  ;;  %s1431_s26 = sshll.u32 %s2004_s25, 4  ;;  %s1432_s26 = int_to_ptr.vmem [resolvable:$true] %s1431_s26 }
  0x14   :  { %1844 = vmatpush3.bf16.msra.mxu0 %v1843_v13  ;;  %v1864_v39 = vpack.c.bf16 %v71_v38, %v70_v37  ;;  %v1867_v42 = vpack.c.bf16 %v73_v41, %v72_v40  ;;  %v74_v43 = vld [vmem:[%s2899_s3 + $0x30] sm:$0xff]  ;;  %v75_v44 = vld [vmem:[%s2899_s3 + $0x38] sm:$0xff]  ;;  %v76_v46 = vld [vmem:[%s2899_s3 + $0x40] sm:$0xff]  ;;  %p1979_p1 = scmp.lt.s32.totalorder %s1432_s26, %s1432_s26 }
  0x15   :  { %1845 = vmatprep.subr.bf16.mxu0 %v1998_v4  ;;  %v1870_v45 = vpack.c.bf16 %v75_v44, %v74_v43  ;;  %v77_v47 = vld [vmem:[%s2899_s3 + $0x48] sm:$0xff]  ;;  %v78_v49 = vld [vmem:[%s2899_s3 + $0x50] sm:$0xff]  ;;  %v79_v50 = vld [vmem:[%s2899_s3 + $0x58] sm:$0xff] }
  0x16   :  { %v1873_v48 = vpack.c.bf16 %v77_v47, %v76_v46  ;;  %v1876_v51 = vpack.c.bf16 %v79_v50, %v78_v49  ;;  %v80_v52 = vld [vmem:[%s2899_s3 + $0x60] sm:$0xff]  ;;  %v81_v53 = vld [vmem:[%s2899_s3 + $0x68] sm:$0xff]  ;;  %v82_v55 = vld [vmem:[%s2899_s3 + $0x70] sm:$0xff] }
  0x17   :  { %v1879_v54 = vpack.c.bf16 %v81_v53, %v80_v52  ;;  %v83_v56 = vld [vmem:[%s2899_s3 + $0x78] sm:$0xff]  ;;  %v2290_v58 = vld [vmem:[%s2918_s5] sm:$0x7]  ;;  %v556_v60 = vld [vmem:[%s2898_s2 + $0x30] sm:$0xff] }
  0x18   :  { %1847 = vmatpush3.bf16.msra.mxu0 %v1846_v16  ;;  %v1882_v57 = vpack.c.bf16 %v83_v56, %v82_v55  ;;  %v2296_v59 = vld [vmem:[%s2904_s8] sm:$0x3f]  ;;  %v557_v61 = vld [vmem:[%s2898_s2 + $0x38] sm:$0xff]  ;;  %v559_v63 = vld [vmem:[%s2898_s2 + $0x48] sm:$0xff] }
  0x19   :  { %1848 = vmatprep.subr.bf16.mxu0 %v1998_v4  ;;  %v558_v62 = vld [vmem:[%s2898_s2 + $0x40] sm:$0xff]  ;;  %v560_v0 = vld [vmem:[%s2898_s2 + $0x50] sm:$0xff]  ;;  %v565_v9 = vld [vmem:[%s2898_s2 + $0x78] sm:$0xff] }
  0x1a   :  { %v562_v5 = vld [vmem:[%s2898_s2 + $0x60] sm:$0xff]  ;;  %v564_v8 = vld [vmem:[%s2898_s2 + $0x70] sm:$0xff]  ;;  %vm1885_vm8 = vmpackc.low %vm942_vm6, %vm2002_vm7 }
  0x1c   :  { %1850 = vmatpush3.bf16.msra.mxu0 %v1849_v19 }
  0x1d   :  { %1851 = vmatprep.subr.bf16.mxu0 %v1998_v4 }
  0x20   :  { %1853 = vmatpush3.bf16.msra.mxu0 %v1852_v22 }
  0x21   :  { %1854 = vmatprep.subr.bf16.mxu0 %v1998_v4 }
  0x24   :  { %1856 = vmatpush3.bf16.msra.mxu0 %v1855_v25 }
  0x25   :  { %1857 = vmatprep.subr.bf16.mxu0 %v1998_v4 }
  0x28   :  { %1859 = vmatpush3.bf16.msra.mxu0 %v1858_v28 }
  0x29   :  { %1745 = vmatprep.subr.mxu0 %v2000_v7 }
  0x2b   :  { %1682 = vmatmul.mubr.f32.vlgmr.msra.gmra.mrb[0].mxu0 %v84_v29 }
  0x2c   :  { %1747 = vmatprep.mubr.msk.f32.mxu0 %vm1999_vm0, %v2000_v7  ;;  %1746 = vmatpush3.msk.msra.mxu0 %vm211_vm1, %v84_v29 }
  0x2d   :  { %1750 = vmatprep.subr.msk.mxu0 %vm623_vm3, %v2296_v59 }
  0x85   :  { %v159_v31 = vpop.permute.xlu0 %158 }
  0xfe   :  { %v151_v33 = vpop.f32.mrb[0].mxu0 }
  0xff   :  { %v161_v34 = vmul.f32 %v159_v31, %v151_v33  ;;  %v1683_v35 = vpop.f32.mrb[1].mxu0 }
 0x101   :  { %1684 = vmatprep.subr.msk.mxu1 %vm211_vm1, %v161_v34 }
 0x102   :  { %1685 = vmatpush3.msk.msra.mxu1 %vm211_vm1, %v161_v34 }
 0x103   :  { %1687 = vmatmul.mubr.msk.f32.vlgmr.msra.gmra.mrb[0].mxu1 %vm162_vm2, %v69_v32  ;;  %1860 = vmatprep.subr.bf16.mxu1 %v1998_v4 }
 0x104   :  { %1862 = vmatpush3.bf16.msra.mxu1 %v1861_v36  ;;  %1689 = vmatprep.mubr.msk.f32.mxu1 %vm162_vm2, %v70_v37 }
 0x105   :  { %1863 = vmatprep.subr.bf16.mxu1 %v1998_v4 }
 0x107   :  { %1690 = vmatmul.mubr.msk.f32.gmra.mrb[2].mxu1 %vm162_vm2, %v71_v38 }
 0x108   :  { %1865 = vmatpush3.bf16.msra.mxu1 %v1864_v39  ;;  %1692 = vmatprep.mubr.msk.f32.mxu1 %vm162_vm2, %v72_v40 }
 0x109   :  { %1866 = vmatprep.subr.bf16.mxu1 %v1998_v4 }
 0x10b   :  { %1693 = vmatmul.mubr.msk.f32.gmra.mrb[4].mxu1 %vm162_vm2, %v73_v41 }
 0x10c   :  { %1868 = vmatpush3.bf16.msra.mxu1 %v1867_v42  ;;  %1695 = vmatprep.mubr.msk.f32.mxu1 %vm162_vm2, %v74_v43  ;;  %v551_v43 = vld [vmem:[%s2898_s2 + $0x8] sm:$0xff] }
 0x10d   :  { %1869 = vmatprep.subr.bf16.mxu1 %v1998_v4 }
 0x10f   :  { %1696 = vmatmul.mubr.msk.f32.gmra.mrb[6].mxu1 %vm162_vm2, %v75_v44  ;;  %v552_v44 = vld [vmem:[%s2898_s2 + $0x10] sm:$0xff] }
 0x110   :  { %1871 = vmatpush3.bf16.msra.mxu1 %v1870_v45  ;;  %1698 = vmatprep.mubr.msk.f32.mxu1 %vm162_vm2, %v76_v46  ;;  %v553_v45 = vld [vmem:[%s2898_s2 + $0x18] sm:$0xff]  ;;  %v554_v46 = vld [vmem:[%s2898_s2 + $0x20] sm:$0xff] }
 0x111   :  { %1872 = vmatprep.subr.bf16.mxu1 %v1998_v4 }
 0x113   :  { %1699 = vmatmul.mubr.msk.f32.gmra.mrb[8].mxu1 %vm162_vm2, %v77_v47  ;;  %v555_v47 = vld [vmem:[%s2898_s2 + $0x28] sm:$0xff] }
 0x114   :  { %1874 = vmatpush3.bf16.msra.mxu1 %v1873_v48  ;;  %1701 = vmatprep.mubr.msk.f32.mxu1 %vm162_vm2, %v78_v49 }
 0x115   :  { %1875 = vmatprep.subr.bf16.mxu1 %v1998_v4 }
 0x117   :  { %1702 = vmatmul.mubr.msk.f32.gmra.mrb[10].mxu1 %vm162_vm2, %v79_v50 }
 0x118   :  { %1877 = vmatpush3.bf16.msra.mxu1 %v1876_v51  ;;  %1704 = vmatprep.mubr.msk.f32.mxu1 %vm162_vm2, %v80_v52 }
 0x119   :  { %1878 = vmatprep.subr.bf16.mxu1 %v1998_v4 }
 0x11b   :  { %1705 = vmatmul.mubr.msk.f32.gmra.mrb[12].mxu1 %vm162_vm2, %v81_v53 }
 0x11c   :  { %1880 = vmatpush3.bf16.msra.mxu1 %v1879_v54  ;;  %1707 = vmatprep.mubr.msk.f32.mxu1 %vm162_vm2, %v82_v55 }
 0x11d   :  { %1881 = vmatprep.subr.bf16.mxu1 %v1998_v4  ;;  %v561_v4 = vld [vmem:[%s2898_s2 + $0x58] sm:$0xff] }
 0x11f   :  { %1708 = vmatmul.mubr.msk.f32.gmra.mrb[14].mxu1 %vm162_vm2, %v83_v56 }
 0x120   :  { %1883 = vmatpush3.bf16.msra.mxu1 %v1882_v57  ;;  %1742 = vmatprep.mubr.msk.f32.mxu1 %vm1999_vm0, %v2000_v7  ;;  %v563_v7 = vld [vmem:[%s2898_s2 + $0x68] sm:$0xff] }
 0x121   :  { %1898 = vmatprep.subr.msk.mxu1 %vm623_vm3, %v2296_v59 }
 0x123   :  { %1743 = vmatmul.mubr.f32.vlgmr.msra.gmra.mrb[16].mxu1 %v2290_v58 }
 0x124   :  { %1899 = vmatpush3.msk.msra.mxu1 %vm623_vm3, %v2296_v59  ;;  %1761 = vmatprep.mubr.msk.f32.mxu1 %vm574_vm4, %v556_v60  ;;  %v885_v60 = vld [vmem:[%s2906_s10 + $0x8] sm:$0xf] }
 0x127   :  { %1762 = vmatmul.mubr.msk.f32.vlgmr.msra.gmra.mrb[18].mxu1 %vm574_vm4, %v557_v61 }
 0x128   :  { %1764 = vmatprep.mubr.msk.f32.mxu1 %vm574_vm4, %v558_v62  ;;  %v1094_v62 = vld [vmem:[#allocation2] sm:$0x1] }
 0x129   :  { %1900 = vpush %v1094_v62 }
 0x12b   :  { %1765 = vmatmul.mubr.msk.f32.gmra.mrb[20].mxu1 %vm574_vm4, %v559_v63  ;;  %v1130_v63 = vld [vmem:[%s2908_s12] sm:$0xff] }
 0x12c   :  { %1767 = vmatprep.mubr.msk.f32.mxu1 %vm574_vm4, %v560_v0  ;;  %v1131_v0 = vld [vmem:[%s2908_s12 + $0x8] sm:$0xff] }
 0x12f   :  { %1768 = vmatmul.mubr.msk.f32.gmra.mrb[22].mxu1 %vm574_vm4, %v561_v4  ;;  %v1890_v4 = vpack.c.bf16 %v1131_v0, %v1130_v63 }
 0x130   :  { %1770 = vmatprep.mubr.msk.f32.mxu1 %vm574_vm4, %v562_v5  ;;  %v1132_v5 = vld [vmem:[%s2908_s12 + $0x10] sm:$0xff] }
 0x131   :  { %1891 = vmatprep.subr.bf16.mxu1 %v1890_v4 }
 0x132   :  { %1893 = vmatpush3.bf16.msra.mxu1 %v1890_v4 }
 0x133   :  { %1771 = vmatmul.mubr.msk.f32.gmra.mrb[24].mxu1 %vm574_vm4, %v563_v7  ;;  %v1133_v7 = vld [vmem:[%s2908_s12 + $0x18] sm:$0xff]  ;;  %s1974_s12 = scalar_lea.vmem %s1432_s26, 64 }
 0x134   :  { %1773 = vmatprep.mubr.msk.f32.mxu1 %vm574_vm4, %v564_v8  ;;  %v1894_v8 = vpack.c.bf16 %v1133_v7, %v1132_v5  ;;  %p1975_p0 = scmp.ne.s32.totalorder %s1432_s26, %s1974_s12  ;;  %p1980_p2 = scmp.lt.s32.totalorder %s1974_s12, %s1974_s12 }
 0x136   :  { %1895 = vmatprep.subr.bf16.mxu1 %v1894_v8  ;;  %p1981_p3 = por %p1980_p2, %p1979_p1 }
 0x137   :  { %1774 = vmatmul.mubr.msk.f32.gmra.mrb[26].mxu1 %vm574_vm4, %v565_v9  ;;  %v2483_v9 = vld [vmem:[%s2905_s9] ss:$0 sm:$0xff] }
 0x138   :  { %1897 = vmatpush3.bf16.msra.mxu1 %v1894_v8  ;;  %p1982_p4 = pnand %p1981_p3, %p1975_p0 }
 0x15a   :  { %s1901_s9 = spop %1900 }
 0x1d6   :  { %v1688_v12 = vpop.f32.mrb[0].mxu1 }
 0x1d7   :  { %v361_v13 = vsub.f32 %v2106_v2, %v1688_v12  ;;  %v281_v16 = vpop.f32.mrb[1].mxu1 }
 0x1d8   :  { %v360_v19 = vsub.f32 %v2101_v1, %v281_v16 }
 0x1d9   :  { %378 = vst.msk [vmem:[%s2909_s13 + $0x8] sm:$0xff] %vm376_vm5, %v361_v13 }
 0x1da   :  { %377 = vst.msk [vmem:[%s2909_s13] sm:$0xff] %vm376_vm5, %v360_v19  ;;  %v1691_v22 = vpop.f32.mrb[2].mxu1 }
 0x1db   :  { %v363_v25 = vsub.f32 %v2119_v6, %v1691_v22  ;;  %v291_v28 = vpop.f32.mrb[3].mxu1 }
 0x1dc   :  { %v362_v29 = vsub.f32 %v2111_v3, %v291_v28 }
 0x1dd   :  { %380 = vst.msk [vmem:[%s2909_s13 + $0x18] sm:$0xff] %vm376_vm5, %v363_v25 }
 0x1de   :  { %379 = vst.msk [vmem:[%s2909_s13 + $0x10] sm:$0xff] %vm376_vm5, %v362_v29  ;;  %v1694_v1 = vpop.f32.mrb[4].mxu1 }
 0x1df   :  { %v365_v2 = vsub.f32 %v2134_v11, %v1694_v1  ;;  %v301_v30 = vpop.f32.mrb[5].mxu1 }
 0x1e0   :  { %v364_v31 = vsub.f32 %v2129_v10, %v301_v30 }
 0x1e1   :  { %382 = vst.msk [vmem:[%s2909_s13 + $0x28] sm:$0xff] %vm376_vm5, %v365_v2 }
 0x1e2   :  { %381 = vst.msk [vmem:[%s2909_s13 + $0x20] sm:$0xff] %vm376_vm5, %v364_v31  ;;  %v1697_v3 = vpop.f32.mrb[6].mxu1 }
 0x1e3   :  { %v367_v6 = vsub.f32 %v2150_v15, %v1697_v3  ;;  %v311_v32 = vpop.f32.mrb[7].mxu1 }
 0x1e4   :  { %v366_v33 = vsub.f32 %v2145_v14, %v311_v32 }
 0x1e5   :  { %384 = vst.msk [vmem:[%s2909_s13 + $0x38] sm:$0xff] %vm376_vm5, %v367_v6 }
 0x1e6   :  { %383 = vst.msk [vmem:[%s2909_s13 + $0x30] sm:$0xff] %vm376_vm5, %v366_v33  ;;  %v1700_v10 = vpop.f32.mrb[8].mxu1 }
 0x1e7   :  { %v369_v11 = vsub.f32 %v2163_v18, %v1700_v10  ;;  %v321_v34 = vpop.f32.mrb[9].mxu1 }
 0x1e8   :  { %v368_v35 = vsub.f32 %v2158_v17, %v321_v34 }
 0x1e9   :  { %386 = vst.msk [vmem:[%s2909_s13 + $0x48] sm:$0xff] %vm376_vm5, %v369_v11 }
 0x1ea   :  { %385 = vst.msk [vmem:[%s2909_s13 + $0x40] sm:$0xff] %vm376_vm5, %v368_v35  ;;  %v1703_v14 = vpop.f32.mrb[10].mxu1 }
 0x1eb   :  { %v371_v15 = vsub.f32 %v2176_v21, %v1703_v14  ;;  %v331_v36 = vpop.f32.mrb[11].mxu1 }
 0x1ec   :  { %v370_v37 = vsub.f32 %v2171_v20, %v331_v36 }
 0x1ed   :  { %388 = vst.msk [vmem:[%s2909_s13 + $0x58] sm:$0xff] %vm376_vm5, %v371_v15 }
 0x1ee   :  { %387 = vst.msk [vmem:[%s2909_s13 + $0x50] sm:$0xff] %vm376_vm5, %v370_v37  ;;  %v1706_v17 = vpop.f32.mrb[12].mxu1 }
 0x1ef   :  { %v373_v18 = vsub.f32 %v2189_v24, %v1706_v17  ;;  %v341_v38 = vpop.f32.mrb[13].mxu1 }
 0x1f0   :  { %v372_v39 = vsub.f32 %v2184_v23, %v341_v38  ;;  %v1470_v23 = vld [vmem:[%s2902_s6] ss:$0 sm:$0xff] }
 0x1f1   :  { %390 = vst.msk [vmem:[%s2909_s13 + $0x68] sm:$0xff] %vm376_vm5, %v373_v18 }
 0x1f2   :  { %389 = vst.msk [vmem:[%s2909_s13 + $0x60] sm:$0xff] %vm376_vm5, %v372_v39  ;;  %v1709_v20 = vpop.f32.mrb[14].mxu1 }
 0x1f3   :  { %v375_v21 = vsub.f32 %v2202_v27, %v1709_v20  ;;  %v351_v40 = vpop.f32.mrb[15].mxu1 }
 0x1f4   :  { %v374_v41 = vsub.f32 %v2197_v26, %v351_v40  ;;  %v550_v26 = vld [vmem:[%s2898_s2] sm:$0xff] }
 0x1f5   :  { %392 = vst.msk [vmem:[%s2909_s13 + $0x78] sm:$0xff] %vm376_vm5, %v375_v21 }
 0x1f6   :  { %391 = vst.msk [vmem:[%s2909_s13 + $0x70] sm:$0xff] %vm376_vm5, %v374_v41  ;;  %v460_v24 = vpop.f32.mrb[16].mxu1 }
 0x1f7   :  { %v471_v42 = vmul.f32 %v1470_v23, %v460_v24  ;;  %v1744_v27 = vpop.f32.mrb[17].mxu1 }
 0x1f9   :  { %1748 = vmatmul.mubr.msk.f32.vlgmr.msra.gmra.mrb[2].mxu0 %vm162_vm2, %v471_v42 }
 0x1fa   :  { %1751 = vmatpush3.msk.msra.mxu0 %vm623_vm3, %v2296_v59  ;;  %1752 = vmatprep.mubr.msk.f32.mxu0 %vm574_vm4, %v550_v26  ;;  %v1763_v48 = vpop.f32.mrb[18].mxu1  ;;  %v884_v59 = vld [vmem:[%s2906_s10] sm:$0xff] }
 0x1fb   :  { %v723_v49 = vpop.f32.mrb[19].mxu1  ;;  %v1884_v61 = vpack.c.bf16 %v885_v60, %v884_v59  ;;  %v2497_v2 = vadd.f32 %v1763_v48, %v2483_v9 }
 0x1fc   :  { %v2486_v12 = vadd.f32 %v2483_v9, %v723_v49 }
 0x1fd   :  { %1753 = vmatmul.mubr.msk.f32.vlgmr.msra.gmra.mrb[4].mxu0 %vm574_vm4, %v551_v43  ;;  %1886 = vmatprep.subr.msk.bf16.mxu0 %vm1885_vm8, %v1884_v61  ;;  %v1498_v10 = vmul.f32 -1.442695, %v2497_v2 }
 0x1fe   :  { %1755 = vmatprep.mubr.msk.f32.mxu0 %vm574_vm4, %v552_v44  ;;  %v1766_v50 = vpop.f32.mrb[20].mxu1  ;;  %1889 = vmatpush3.bf16.msk.msra.mxu0 %vm1885_vm8, %v1884_v61  ;;  %v1497_v22 = vmul.f32 -1.442695, %v2486_v12 }
 0x1ff   :  { %v733_v51 = vpop.f32.mrb[21].mxu1  ;;  %v2512_v11 = vadd.f32 %v1766_v50, %v2483_v9 }
 0x200   :  { %1910 = vpow2.f32 %v1497_v22 }
 0x201   :  { %1756 = vmatmul.mubr.msk.f32.gmra.mrb[6].mxu0 %vm574_vm4, %v553_v45  ;;  %v1500_v39 = vmul.f32 -1.442695, %v2512_v11 }
 0x202   :  { %1758 = vmatprep.mubr.msk.f32.mxu0 %vm574_vm4, %v554_v46  ;;  %v1769_v52 = vpop.f32.mrb[22].mxu1 }
 0x203   :  { %v743_v53 = vpop.f32.mrb[23].mxu1  ;;  %v2517_v14 = vadd.f32 %v1769_v52, %v2483_v9 }
 0x204   :  { %v2521_v37 = vadd.f32 %v2483_v9, %v743_v53 }
 0x205   :  { %1759 = vmatmul.mubr.msk.f32.gmra.mrb[8].mxu0 %vm574_vm4, %v555_v47  ;;  %v1502_v21 = vmul.f32 -1.442695, %v2517_v14 }
 0x206   :  { %v2454_v54 = vpop.f32.mrb[24].mxu1  ;;  %v1501_v23 = vmul.f32 -1.442695, %v2521_v37 }
 0x207   :  { %v2456_v55 = vpop.f32.mrb[25].mxu1  ;;  %v2540_v43 = vadd.f32 %v2454_v54, %v2483_v9 }
 0x208   :  { %v2536_v24 = vadd.f32 %v2483_v9, %v2456_v55 }
 0x209   :  { %v1504_v50 = vmul.f32 -1.442695, %v2540_v43 }
 0x20a   :  { %v2458_v56 = vpop.f32.mrb[26].mxu1  ;;  %v1911_v41 = vpop.eup %1910  ;;  %v1503_v45 = vmul.f32 -1.442695, %v2536_v24 }
 0x20b   :  { %v2460_v57 = vpop.f32.mrb[27].mxu1  ;;  %v826_v26 = vadd.f32 1.0, %v1911_v41  ;;  %v2550_v53 = vadd.f32 %v2458_v56, %v2483_v9 }
 0x20c   :  { %v2545_v47 = vadd.f32 %v2483_v9, %v2460_v57 }
 0x20d   :  { %v1506_v63 = vmul.f32 -1.442695, %v2550_v53 }
 0x20e   :  { %v1505_v54 = vmul.f32 -1.442695, %v2545_v47 }
 0x2cc   :  { %v544_v13 = vpop.f32.mrb[2].mxu0 }
 0x2cd   :  { %v548_v16 = vsub.f32 %v2290_v58, %v544_v13  ;;  %v1749_v19 = vpop.f32.mrb[3].mxu0  ;;  %v2501_v58 = vadd.f32 %v2483_v9, %v733_v51 }
 0x2cf   :  { %549 = vst [vmem:[#allocation3] sm:$0x7] %v548_v16  ;;  %v1499_v35 = vmul.f32 -1.442695, %v2501_v58 }
 0x2d0   :  { %v1754_v25 = vpop.f32.mrb[4].mxu0 }
 0x2d1   :  { %v2491_v28 = vadd.f32 %v1754_v25, %v2483_v9  ;;  %v693_v29 = vpop.f32.mrb[5].mxu0 }
 0x2d2   :  { %v2494_v1 = vadd.f32 %v2483_v9, %v693_v29 }
 0x2d3   :  { %v1492_v30 = vmul.f32 -1.442695, %v2491_v28 }
 0x2d4   :  { %v1491_v31 = vmul.f32 -1.442695, %v2494_v1  ;;  %v1757_v3 = vpop.f32.mrb[6].mxu0 }
 0x2d5   :  { %1912 = vpow2.f32 %v1492_v30  ;;  %v2505_v6 = vadd.f32 %v1757_v3, %v2483_v9  ;;  %v703_v32 = vpop.f32.mrb[7].mxu0 }
 0x2d6   :  { %1914 = vpow2.f32 %v1491_v31  ;;  %v2508_v33 = vadd.f32 %v2483_v9, %v703_v32 }
 0x2d7   :  { %v1494_v34 = vmul.f32 -1.442695, %v2505_v6 }
 0x2d8   :  { %v1493_v15 = vmul.f32 -1.442695, %v2508_v33  ;;  %v1760_v36 = vpop.f32.mrb[8].mxu0 }
 0x2d9   :  { %1916 = vpow2.f32 %v1494_v34  ;;  %v2524_v17 = vadd.f32 %v1760_v36, %v2483_v9  ;;  %v713_v18 = vpop.f32.mrb[9].mxu0 }
 0x2da   :  { %1918 = vpow2.f32 %v1493_v15  ;;  %v2527_v38 = vadd.f32 %v2483_v9, %v713_v18 }
 0x2db   :  { %1920 = vpow2.f32 %v1498_v10  ;;  %v1496_v20 = vmul.f32 -1.442695, %v2524_v17 }
 0x2dc   :  { %1922 = vpow2.f32 %v1499_v35  ;;  %v1495_v40 = vmul.f32 -1.442695, %v2527_v38 }
 0x2dd   :  { %1924 = vpow2.f32 %v1496_v20 }
 0x2de   :  { %1926 = vpow2.f32 %v1495_v40 }
 0x2df   :  { %v1913_v42 = vpop.eup %1912  ;;  %1928 = vpow2.f32 %v1500_v39 }
 0x2e0   :  { %v1915_v27 = vpop.eup %1914  ;;  %1930 = vpow2.f32 %v1502_v21  ;;  %v821_v44 = vadd.f32 1.0, %v1913_v42 }
 0x2e1   :  { %1932 = vpow2.f32 %v1501_v23  ;;  %v820_v46 = vadd.f32 1.0, %v1915_v27 }
 0x2e2   :  { %1934 = vrcp.f32 %v821_v44 }
 0x2e3   :  { %v1917_v48 = vpop.eup %1916  ;;  %1936 = vrcp.f32 %v820_v46 }
 0x2e4   :  { %v1919_v49 = vpop.eup %1918  ;;  %1938 = vrcp.f32 %v826_v26  ;;  %v823_v51 = vadd.f32 1.0, %v1917_v48 }
 0x2e5   :  { %v1921_v52 = vpop.eup %1920  ;;  %1940 = vpow2.f32 %v1503_v45  ;;  %v822_v55 = vadd.f32 1.0, %v1919_v49 }
 0x2e6   :  { %v1923_v59 = vpop.eup %1922  ;;  %1942 = vrcp.f32 %v823_v51  ;;  %v827_v5 = vadd.f32 1.0, %v1921_v52  ;;  %v2593_v51 = vstv %s1901_s9 }
 0x2e7   :  { %v1925_v57 = vpop.eup %1924  ;;  %1944 = vrcp.f32 %v822_v55  ;;  %v828_v7 = vadd.f32 1.0, %v1923_v59 }
 0x2e8   :  { %v1927_v60 = vpop.eup %1926  ;;  %1946 = vpow2.f32 %v1504_v50  ;;  %v825_v61 = vadd.f32 1.0, %v1925_v57  ;;  %v2591_v50 = vld [vmem:[%s2907_s11] ss:$0 sm:$0xff] }
 0x2e9   :  { %v1929_v62 = vpop.eup %1928  ;;  %1948 = vpow2.f32 %v1505_v54  ;;  %v824_v0 = vadd.f32 1.0, %v1927_v60 }
 0x2ea   :  { %v1931_v4 = vpop.eup %1930  ;;  %1950 = vrcp.f32 %v825_v61  ;;  %v829_v16 = vadd.f32 1.0, %v1929_v62 }
 0x2eb   :  { %v1933_v56 = vpop.eup %1932  ;;  %1952 = vrcp.f32 %v824_v0  ;;  %v831_v32 = vadd.f32 1.0, %v1931_v4 }
 0x2ec   :  { %v1935_v8 = vpop.eup %1934  ;;  %1954 = vpow2.f32 %v1506_v63  ;;  %v830_v25 = vadd.f32 1.0, %v1933_v56 }
 0x2ed   :  { %v1937_v9 = vpop.eup %1936  ;;  %1956 = vrcp.f32 %v827_v5  ;;  %v869_v29 = vmul.f32 %v1935_v8, %v2491_v28 }
 0x2ee   :  { %v1939_v13 = vpop.eup %1938  ;;  %v868_v19 = vmul.f32 %v1937_v9, %v2494_v1  ;;  %1958 = vrcp.f32 %v828_v7 }
 0x2ef   :  { %v1941_v22 = vpop.eup %1940  ;;  %1960 = vrcp.f32 %v829_v16  ;;  %v874_v40 = vmul.f32 %v1939_v13, %v2486_v12 }
 0x2f0   :  { %v1943_v30 = vpop.eup %1942  ;;  %1780 = vmatprep.mubr.msk.f32.mxu0 %vm893_vm9, %v868_v19  ;;  %1962 = vrcp.f32 %v830_v25  ;;  %v832_v35 = vadd.f32 1.0, %v1941_v22 }
 0x2f1   :  { %v1945_v31 = vpop.eup %1944  ;;  %1781 = vmatmul.mubr.msk.f32.vlgmr.msra.gmra.mrb[10].mxu0 %vm893_vm9, %v869_v29  ;;  %v871_v1 = vmul.f32 %v1943_v30, %v2505_v6  ;;  %1964 = vrcp.f32 %v831_v32 }
 0x2f2   :  { %v1947_v3 = vpop.eup %1946  ;;  %v870_v10 = vmul.f32 %v1945_v31, %v2508_v33  ;;  %1966 = vrcp.f32 %v832_v35 }
 0x2f3   :  { %v1949_v34 = vpop.eup %1948  ;;  %v833_v36 = vadd.f32 1.0, %v1947_v3 }
 0x2f4   :  { %v1951_v15 = vpop.eup %1950  ;;  %1783 = vmatprep.mubr.msk.f32.mxu0 %vm893_vm9, %v870_v10  ;;  %v834_v20 = vadd.f32 1.0, %v1949_v34 }
 0x2f5   :  { %v1953_v28 = vpop.eup %1952  ;;  %1784 = vmatmul.mubr.msk.f32.gmra.mrb[12].mxu0 %vm893_vm9, %v871_v1  ;;  %v873_v33 = vmul.f32 %v1951_v15, %v2524_v17  ;;  %1968 = vrcp.f32 %v833_v36 }
 0x2f6   :  { %v872_v18 = vmul.f32 %v1953_v28, %v2527_v38  ;;  %v1955_v39 = vpop.eup %1954  ;;  %1970 = vrcp.f32 %v834_v20 }
 0x2f7   :  { %v1957_v21 = vpop.eup %1956  ;;  %v835_v41 = vadd.f32 1.0, %v1955_v39 }
 0x2f8   :  { %1786 = vmatprep.mubr.msk.f32.mxu0 %vm893_vm9, %v872_v18  ;;  %v1959_v6 = vpop.eup %1958  ;;  %v875_v23 = vmul.f32 %v1957_v21, %v2497_v2 }
 0x2f9   :  { %1787 = vmatmul.mubr.msk.f32.gmra.mrb[14].mxu0 %vm893_vm9, %v873_v33  ;;  %v1961_v38 = vpop.eup %1960  ;;  %v876_v42 = vmul.f32 %v1959_v6, %v2501_v58  ;;  %1972 = vrcp.f32 %v835_v41 }
 0x2fa   :  { %1789 = vmatprep.mubr.msk.f32.mxu0 %vm893_vm9, %v874_v40  ;;  %v1963_v27 = vpop.eup %1962  ;;  %v877_v12 = vmul.f32 %v1961_v38, %v2512_v11 }
 0x2fb   :  { %v1965_v17 = vpop.eup %1964  ;;  %v878_v26 = vmul.f32 %v1963_v27, %v2521_v37 }
 0x2fc   :  { %v1967_v44 = vpop.eup %1966  ;;  %v879_v2 = vmul.f32 %v1965_v17, %v2517_v14  ;;  %v1091_v14 = vlaneseq }
 0x2fd   :  { %1790 = vmatmul.mubr.msk.f32.gmra.mrb[16].mxu0 %vm893_vm9, %v875_v23  ;;  %v880_v58 = vmul.f32 %v1967_v44, %v2536_v24 }
 0x2fe   :  { %1792 = vmatprep.mubr.msk.f32.mxu0 %vm893_vm9, %v876_v42  ;;  %v2586_v24 = vand.u32 127, %v1091_v14 }
 0x2ff   :  { %v1969_v45 = vpop.eup %1968 }
 0x300   :  { %v1971_v46 = vpop.eup %1970  ;;  %v881_v11 = vmul.f32 %v1969_v45, %v2540_v43  ;;  %vm1093_vm10 = vcmp.eq.s32.totalorder %v2586_v24, 31 }
 0x301   :  { %1793 = vmatmul.mubr.msk.f32.gmra.mrb[18].mxu0 %vm893_vm9, %v877_v12  ;;  %v882_v37 = vmul.f32 %v1971_v46, %v2545_v47 }
 0x302   :  { %1795 = vmatprep.mubr.msk.f32.mxu0 %vm893_vm9, %v878_v26 }
 0x303   :  { %v1973_v48 = vpop.eup %1972 }
 0x304   :  { %v883_v49 = vmul.f32 %v1973_v48, %v2550_v53 }
 0x305   :  { %1796 = vmatmul.mubr.msk.f32.gmra.mrb[20].mxu0 %vm893_vm9, %v879_v2 }
 0x306   :  { %1798 = vmatprep.mubr.msk.f32.mxu0 %vm893_vm9, %v880_v58 }
 0x309   :  { %1799 = vmatmul.mubr.msk.f32.gmra.mrb[22].mxu0 %vm893_vm9, %v881_v11 }
 0x30a   :  { %1801 = vmatprep.mubr.msk.f32.mxu0 %vm893_vm9, %v882_v37 }
 0x30d   :  { %1802 = vmatmul.mubr.msk.f32.gmra.mrb[24].mxu0 %vm893_vm9, %v883_v49 }
 0x3c4   :  { %v1782_v43 = vpop.f32.mrb[10].mxu0 }
 0x3c5   :  { %v1018_v47 = vadd.f32 %v1782_v43, %v2591_v50  ;;  %v1012_v52 = vpop.f32.mrb[11].mxu0 }
 0x3c6   :  { %v1013_v53 = vadd.f32 %v2591_v50, %v1012_v52 }
 0x3c7   :  { %v1098_v54 = vsel %vm1093_vm10, %v2593_v51, %v1018_v47 }
 0x3c8   :  { %v1785_v55 = vpop.f32.mrb[12].mxu0  ;;  %v1097_v59 = vsel %vm1093_vm10, %v2593_v51, %v1013_v53  ;;  %1115 = vst.msk [vmem:[%s2911_s15 + $0x8] sm:$0xff] %vm1113_vm11, %v1098_v54 }
 0x3c9   :  { %v1028_v57 = vadd.f32 %v1785_v55, %v2591_v50  ;;  %v1022_v60 = vpop.f32.mrb[13].mxu0  ;;  %1114 = vst.msk [vmem:[%s2911_s15] sm:$0xff] %vm1113_vm11, %v1097_v59  ;;  %1812 = vmatprep.mubr.msk.f32.mxu1 %vm1113_vm11, %v1097_v59 }
 0x3ca   :  { %v1023_v61 = vadd.f32 %v2591_v50, %v1022_v60  ;;  %1813 = vmatmul.mubr.msk.f32.vlgmr.msra.gmra.mrb[28].mxu1 %vm1113_vm11, %v1098_v54 }
 0x3cb   :  { %v1100_v62 = vsel %vm1093_vm10, %v2593_v51, %v1028_v57 }
 0x3cc   :  { %v1788_v63 = vpop.f32.mrb[14].mxu0  ;;  %v1099_v0 = vsel %vm1093_vm10, %v2593_v51, %v1023_v61  ;;  %1117 = vst.msk [vmem:[%s2911_s15 + $0x18] sm:$0xff] %vm1113_vm11, %v1100_v62 }
 0x3cd   :  { %v1038_v4 = vadd.f32 %v1788_v63, %v2591_v50  ;;  %v1032_v5 = vpop.f32.mrb[15].mxu0  ;;  %1116 = vst.msk [vmem:[%s2911_s15 + $0x10] sm:$0xff] %vm1113_vm11, %v1099_v0  ;;  %1815 = vmatprep.mubr.msk.f32.mxu1 %vm1113_vm11, %v1099_v0 }
 0x3ce   :  { %v1033_v56 = vadd.f32 %v2591_v50, %v1032_v5  ;;  %1816 = vmatmul.mubr.msk.f32.gmra.mrb[30].mxu1 %vm1113_vm11, %v1100_v62 }
 0x3cf   :  { %v1102_v7 = vsel %vm1093_vm10, %v2593_v51, %v1038_v4 }
 0x3d0   :  { %v1791_v8 = vpop.f32.mrb[16].mxu0  ;;  %v1101_v9 = vsel %vm1093_vm10, %v2593_v51, %v1033_v56  ;;  %1119 = vst.msk [vmem:[%s2911_s15 + $0x28] sm:$0xff] %vm1113_vm11, %v1102_v7 }
 0x3d1   :  { %v1048_v13 = vadd.f32 %v1791_v8, %v2591_v50  ;;  %v1042_v16 = vpop.f32.mrb[17].mxu0  ;;  %1118 = vst.msk [vmem:[%s2911_s15 + $0x20] sm:$0xff] %vm1113_vm11, %v1101_v9  ;;  %1818 = vmatprep.mubr.msk.f32.mxu1 %vm1113_vm11, %v1101_v9 }
 0x3d2   :  { %v1043_v19 = vadd.f32 %v2591_v50, %v1042_v16  ;;  %1819 = vmatmul.mubr.msk.f32.gmra.mrb[32].mxu1 %vm1113_vm11, %v1102_v7 }
 0x3d3   :  { %v1104_v22 = vsel %vm1093_vm10, %v2593_v51, %v1048_v13 }
 0x3d4   :  { %v1794_v25 = vpop.f32.mrb[18].mxu0  ;;  %v1103_v29 = vsel %vm1093_vm10, %v2593_v51, %v1043_v19  ;;  %1121 = vst.msk [vmem:[%s2911_s15 + $0x38] sm:$0xff] %vm1113_vm11, %v1104_v22 }
 0x3d5   :  { %v1058_v30 = vadd.f32 %v1794_v25, %v2591_v50  ;;  %v1052_v31 = vpop.f32.mrb[19].mxu0  ;;  %1120 = vst.msk [vmem:[%s2911_s15 + $0x30] sm:$0xff] %vm1113_vm11, %v1103_v29  ;;  %1821 = vmatprep.mubr.msk.f32.mxu1 %vm1113_vm11, %v1103_v29 }
 0x3d6   :  { %v1053_v3 = vadd.f32 %v2591_v50, %v1052_v31  ;;  %1822 = vmatmul.mubr.msk.f32.gmra.mrb[34].mxu1 %vm1113_vm11, %v1104_v22 }
 0x3d7   :  { %v1106_v32 = vsel %vm1093_vm10, %v2593_v51, %v1058_v30 }
 0x3d8   :  { %v1797_v10 = vpop.f32.mrb[20].mxu0  ;;  %v1105_v34 = vsel %vm1093_vm10, %v2593_v51, %v1053_v3  ;;  %1123 = vst.msk [vmem:[%s2911_s15 + $0x48] sm:$0xff] %vm1113_vm11, %v1106_v32 }
 0x3d9   :  { %v1068_v35 = vadd.f32 %v1797_v10, %v2591_v50  ;;  %v1062_v1 = vpop.f32.mrb[21].mxu0  ;;  %1122 = vst.msk [vmem:[%s2911_s15 + $0x40] sm:$0xff] %vm1113_vm11, %v1105_v34  ;;  %1824 = vmatprep.mubr.msk.f32.mxu1 %vm1113_vm11, %v1105_v34 }
 0x3da   :  { %v1063_v15 = vadd.f32 %v2591_v50, %v1062_v1  ;;  %1825 = vmatmul.mubr.msk.f32.gmra.mrb[36].mxu1 %vm1113_vm11, %v1106_v32 }
 0x3db   :  { %v1108_v28 = vsel %vm1093_vm10, %v2593_v51, %v1068_v35 }
 0x3dc   :  { %v1800_v36 = vpop.f32.mrb[22].mxu0  ;;  %v1107_v18 = vsel %vm1093_vm10, %v2593_v51, %v1063_v15  ;;  %1125 = vst.msk [vmem:[%s2911_s15 + $0x58] sm:$0xff] %vm1113_vm11, %v1108_v28 }
 0x3dd   :  { %v1078_v39 = vadd.f32 %v1800_v36, %v2591_v50  ;;  %v1072_v20 = vpop.f32.mrb[23].mxu0  ;;  %1124 = vst.msk [vmem:[%s2911_s15 + $0x50] sm:$0xff] %vm1113_vm11, %v1107_v18  ;;  %1827 = vmatprep.mubr.msk.f32.mxu1 %vm1113_vm11, %v1107_v18 }
 0x3de   :  { %v1073_v33 = vadd.f32 %v2591_v50, %v1072_v20  ;;  %1828 = vmatmul.mubr.msk.f32.gmra.mrb[38].mxu1 %vm1113_vm11, %v1108_v28 }
 0x3df   :  { %v1110_v21 = vsel %vm1093_vm10, %v2593_v51, %v1078_v39 }
 0x3e0   :  { %v1803_v40 = vpop.f32.mrb[24].mxu0  ;;  %v1109_v6 = vsel %vm1093_vm10, %v2593_v51, %v1073_v33  ;;  %1127 = vst.msk [vmem:[%s2911_s15 + $0x68] sm:$0xff] %vm1113_vm11, %v1110_v21 }
 0x3e1   :  { %v1088_v41 = vadd.f32 %v1803_v40, %v2591_v50  ;;  %v1082_v23 = vpop.f32.mrb[25].mxu0  ;;  %1126 = vst.msk [vmem:[%s2911_s15 + $0x60] sm:$0xff] %vm1113_vm11, %v1109_v6  ;;  %1830 = vmatprep.mubr.msk.f32.mxu1 %vm1113_vm11, %v1109_v6 }
 0x3e2   :  { %v1083_v38 = vadd.f32 %v2591_v50, %v1082_v23  ;;  %1831 = vmatmul.mubr.msk.f32.gmra.mrb[40].mxu1 %vm1113_vm11, %v1110_v21 }
 0x3e3   :  { %v1112_v42 = vsel %vm1093_vm10, %v2593_v51, %v1088_v41 }
 0x3e4   :  { %v1111_v27 = vsel %vm1093_vm10, %v2593_v51, %v1083_v38  ;;  %1129 = vst.msk [vmem:[%s2911_s15 + $0x78] sm:$0xff] %vm1113_vm11, %v1112_v42 }
 0x3e5   :  { %1128 = vst.msk [vmem:[%s2911_s15 + $0x70] sm:$0xff] %vm1113_vm11, %v1111_v27  ;;  %1833 = vmatprep.mubr.msk.f32.mxu1 %vm1113_vm11, %v1111_v27 }
 0x3e6   :  { %1834 = vmatmul.mubr.msk.f32.gmra.mrb[42].mxu1 %vm1113_vm11, %v1112_v42 }
 0x49d   :  { %v1814_v12 = vpop.f32.mrb[28].mxu1 }
 0x49e   :  { %1328 = vst.msk [vmem:[%s2912_s16 + $0x8] sm:$0xff] %vm1113_vm11, %v1814_v12  ;;  %1361 = vrot.lane.b32.xlu1 %v1814_v12, %s2003_s30  ;;  %v1248_v17 = vpop.f32.mrb[29].mxu1 }
 0x49f   :  { %1327 = vst.msk [vmem:[%s2912_s16] sm:$0xff] %vm1113_vm11, %v1248_v17  ;;  %1359 = vrot.lane.b32.xlu0 %v1248_v17, %s2003_s30 }
 0x4a1   :  { %v1817_v26 = vpop.f32.mrb[30].mxu1 }
 0x4a2   :  { %1330 = vst.msk [vmem:[%s2912_s16 + $0x18] sm:$0xff] %vm1113_vm11, %v1817_v26  ;;  %v1258_v44 = vpop.f32.mrb[31].mxu1 }
 0x4a3   :  { %1329 = vst.msk [vmem:[%s2912_s16 + $0x10] sm:$0xff] %vm1113_vm11, %v1258_v44  ;;  %1365 = vrot.lane.b32.xlu0 %v1817_v26, %s2003_s30  ;;  %1363 = vrot.lane.b32.xlu1 %v1258_v44, %s2003_s30 }
 0x4a5   :  { %v1820_v2 = vpop.f32.mrb[32].mxu1 }
 0x4a6   :  { %1332 = vst.msk [vmem:[%s2912_s16 + $0x28] sm:$0xff] %vm1113_vm11, %v1820_v2  ;;  %v1268_v45 = vpop.f32.mrb[33].mxu1 }
 0x4a7   :  { %1331 = vst.msk [vmem:[%s2912_s16 + $0x20] sm:$0xff] %vm1113_vm11, %v1268_v45  ;;  %1369 = vrot.lane.b32.xlu0 %v1820_v2, %s2003_s30  ;;  %1367 = vrot.lane.b32.xlu1 %v1268_v45, %s2003_s30 }
 0x4a9   :  { %v1823_v58 = vpop.f32.mrb[34].mxu1 }
 0x4aa   :  { %1334 = vst.msk [vmem:[%s2912_s16 + $0x38] sm:$0xff] %vm1113_vm11, %v1823_v58  ;;  %v1278_v46 = vpop.f32.mrb[35].mxu1 }
 0x4ab   :  { %1333 = vst.msk [vmem:[%s2912_s16 + $0x30] sm:$0xff] %vm1113_vm11, %v1278_v46  ;;  %1373 = vrot.lane.b32.xlu0 %v1823_v58, %s2003_s30  ;;  %1371 = vrot.lane.b32.xlu1 %v1278_v46, %s2003_s30 }
 0x4ad   :  { %v1826_v11 = vpop.f32.mrb[36].mxu1 }
 0x4ae   :  { %1336 = vst.msk [vmem:[%s2912_s16 + $0x48] sm:$0xff] %vm1113_vm11, %v1826_v11  ;;  %v1288_v48 = vpop.f32.mrb[37].mxu1 }
 0x4af   :  { %1985 = shalt.err (!%p1982_p4)
}
 0x4b0   :  { %s1986_s29 = scalar_lea.hbm %s2910_s14, 64 }
 0x4b1   :  { %p1987_p5 = scmp.ne.s32.totalorder %s2910_s14, %s1986_s29  ;;  %p1990_p6 = scmp.lt.u32.totalorder %s1986_s29, %s2910_s14 }
 0x4b3   :  { %p1992_p7 = pnand %p1990_p6, %p1987_p5 }
 0x4b5   :  { %1995 = shalt.err (!%p1992_p7)
}
 0x4b6   :  { %1434 = dma.vmem_to_hbm [thread:$0]  %s1432_s26, 64, %s2910_s14, [#allocation4]   ;;  %1335 = vst.msk [vmem:[%s2912_s16 + $0x40] sm:$0xff] %vm1113_vm11, %v1288_v48  ;;  %1377 = vrot.lane.b32.xlu0 %v1826_v11, %s2003_s30  ;;  %1375 = vrot.lane.b32.xlu1 %v1288_v48, %s2003_s30  ;;  %v1829_v37 = vpop.f32.mrb[38].mxu1 }
 0x4b7   :  { %1338 = vst.msk [vmem:[%s2912_s16 + $0x58] sm:$0xff] %vm1113_vm11, %v1829_v37  ;;  %v1298_v49 = vpop.f32.mrb[39].mxu1 }
 0x4b8   :  { %1337 = vst.msk [vmem:[%s2912_s16 + $0x50] sm:$0xff] %vm1113_vm11, %v1298_v49  ;;  %v1832_v14 = vpop.f32.mrb[40].mxu1 }
 0x4b9   :  { %1340 = vst.msk [vmem:[%s2912_s16 + $0x68] sm:$0xff] %vm1113_vm11, %v1832_v14  ;;  %v1308_v24 = vpop.f32.mrb[41].mxu1 }
 0x4ba   :  { %1381 = vrot.lane.b32.xlu0 %v1829_v37, %s2003_s30  ;;  %1379 = vrot.lane.b32.xlu1 %v1298_v49, %s2003_s30  ;;  %1339 = vst.msk [vmem:[%s2912_s16 + $0x60] sm:$0xff] %vm1113_vm11, %v1308_v24  ;;  %v1835_v50 = vpop.f32.mrb[42].mxu1 }
 0x4bb   :  { %1342 = vst.msk [vmem:[%s2912_s16 + $0x78] sm:$0xff] %vm1113_vm11, %v1835_v50  ;;  %v1318_v43 = vpop.f32.mrb[43].mxu1 }
 0x4bc   :  { %1341 = vst.msk [vmem:[%s2912_s16 + $0x70] sm:$0xff] %vm1113_vm11, %v1318_v43 }
 0x4be   :  { %1385 = vrot.lane.b32.xlu0 %v1832_v14, %s2003_s30  ;;  %1383 = vrot.lane.b32.xlu1 %v1308_v24, %s2003_s30 }
 0x4c2   :  { %1389 = vrot.lane.b32.xlu0 %v1835_v50, %s2003_s30  ;;  %1387 = vrot.lane.b32.xlu1 %v1318_v43, %s2003_s30 }
 0x510   :  { %v1362_v51 = vpop.permute.xlu1 %1361 }
 0x511   :  { %1408 = vst.msk [vmem:[%s2913_s17 + $0x8] sm:$0xff] %vm1113_vm11, %v1362_v51  ;;  %v1360_v47 = vpop.permute.xlu0 %1359 }
 0x512   :  { %1407 = vst.msk [vmem:[%s2913_s17] sm:$0xff] %vm1113_vm11, %v1360_v47 }
 0x515   :  { %v1366_v52 = vpop.permute.xlu0 %1365  ;;  %v1364_v53 = vpop.permute.xlu1 %1363 }
 0x516   :  { %1410 = vst.msk [vmem:[%s2913_s17 + $0x18] sm:$0xff] %vm1113_vm11, %v1366_v52  ;;  %1409 = vst.msk [vmem:[%s2913_s17 + $0x10] sm:$0xff] %vm1113_vm11, %v1364_v53 }
 0x519   :  { %v1370_v54 = vpop.permute.xlu0 %1369  ;;  %v1368_v55 = vpop.permute.xlu1 %1367 }
 0x51a   :  { %1412 = vst.msk [vmem:[%s2913_s17 + $0x28] sm:$0xff] %vm1113_vm11, %v1370_v54  ;;  %1411 = vst.msk [vmem:[%s2913_s17 + $0x20] sm:$0xff] %vm1113_vm11, %v1368_v55 }
 0x51d   :  { %v1374_v59 = vpop.permute.xlu0 %1373  ;;  %v1372_v57 = vpop.permute.xlu1 %1371 }
 0x51e   :  { %1414 = vst.msk [vmem:[%s2913_s17 + $0x38] sm:$0xff] %vm1113_vm11, %v1374_v59  ;;  %1413 = vst.msk [vmem:[%s2913_s17 + $0x30] sm:$0xff] %vm1113_vm11, %v1372_v57 }
 0x528   :  { %v1378_v60 = vpop.permute.xlu0 %1377  ;;  %v1376_v61 = vpop.permute.xlu1 %1375 }
 0x529   :  { %1416 = vst.msk [vmem:[%s2913_s17 + $0x48] sm:$0xff] %vm1113_vm11, %v1378_v60  ;;  %1415 = vst.msk [vmem:[%s2913_s17 + $0x40] sm:$0xff] %vm1113_vm11, %v1376_v61 }
 0x52c   :  { %v1382_v62 = vpop.permute.xlu0 %1381  ;;  %v1380_v63 = vpop.permute.xlu1 %1379 }
 0x52d   :  { %1418 = vst.msk [vmem:[%s2913_s17 + $0x58] sm:$0xff] %vm1113_vm11, %v1382_v62  ;;  %1417 = vst.msk [vmem:[%s2913_s17 + $0x50] sm:$0xff] %vm1113_vm11, %v1380_v63 }
 0x530   :  { %v1386_v0 = vpop.permute.xlu0 %1385  ;;  %v1384_v4 = vpop.permute.xlu1 %1383 }
 0x531   :  { %1420 = vst.msk [vmem:[%s2913_s17 + $0x68] sm:$0xff] %vm1113_vm11, %v1386_v0  ;;  %1419 = vst.msk [vmem:[%s2913_s17 + $0x60] sm:$0xff] %vm1113_vm11, %v1384_v4 }
 0x534   :  { %v1390_v5 = vpop.permute.xlu0 %1389  ;;  %v1388_v56 = vpop.permute.xlu1 %1387 }
 0x535   :  { %1422 = vst.msk [vmem:[%s2913_s17 + $0x78] sm:$0xff] %vm1113_vm11, %v1390_v5  ;;  %1421 = vst.msk [vmem:[%s2913_s17 + $0x70] sm:$0xff] %vm1113_vm11, %v1388_v56 }
 0x536   :  { %1996 = dma.done.wait [#allocation4], 64  }
 0x537   :  { %1997 = vsyncadd [#allocation4], 4294967232 }
 0x538   :  { %1452 = vsyncpa [#allocation4], 1 }

</bundles_post_ra>
